<compile_context>
chip_gen: v7x
topology: tpu7x:2x2x1
jax: 0.10.0
libtpu: 0.0.40
codegen_flags: <defaults>
</compile_context>

<pallas_src>
import jax
import jax.numpy as jnp
from jax.experimental import pallas as pl
from jax.experimental.pallas import tpu as pltpu

IN_DIM = 128  # fixed by the module: nn.Linear(128, features)


def _round_up(x, m):
    return ((x + m - 1) // m) * m


def _decoder_kernel(x_ref, w_ref, b_ref, o_ref):
    # x_ref: (TB, 128)  w_ref: (128, TN)  b_ref: (1, TN)  o_ref: (TB, TN)
    y = jnp.dot(x_ref[...], w_ref[...], preferred_element_type=jnp.float32)
    y = y + b_ref[...].astype(jnp.float32)        # bias broadcast over rows
    y = jnp.maximum(y, 0.0)                       # ReLU  (VPU)
    o_ref[...] = jax.nn.sigmoid(y).astype(o_ref.dtype)   # sigmoid (EUP exp + VPU)


def decoder_forward(x, w, b, *, tile_b=None, tile_n=None, compute_dtype=None):
    """Decoder forward: sigmoid(relu(x @ w + b)).

    x: (B, 128)             activations
    w: (128, F)             Linear(128, F) weight, pre-transposed from PyTorch's (F, 128)
    b: (F,)                 Linear bias
    returns: (B, F) in x.dtype
    """
    B, K = x.shape
    assert K == IN_DIM, f"Decoder expects inner dim {IN_DIM}, got {K}"
    assert w.shape[0] == IN_DIM
    F = w.shape[1]
    assert b.shape == (F,)

    out_dtype = x.dtype
    if compute_dtype is not None:
        # bf16 operands halve HBM traffic; accumulation stays f32 in-kernel.
        x = x.astype(compute_dtype)
        w = w.astype(compute_dtype)

    # --- Tile selection ------------------------------------------------------
    # Large batch tiles amortize the ~0.35 us per-grid-step overhead and fill
    # the MXU along M (measured: 512-row tiles ~ 85% of HBM roofline).
    if tile_b is None:
        tile_b = B if B <= 512 else 512          # multiple of 8 when tiling
    if tile_n is None:
        tile_n = F if F <= 512 else 512          # multiple of 128 when tiling

    # --- Pad so the grid always runs at the chosen tile size -----------------
    Bp = _round_up(B, tile_b)
    Fp = _round_up(F, tile_n)
    if Bp != B:
        x = jnp.pad(x, ((0, Bp - B), (0, 0)))
    if Fp != F:
        w = jnp.pad(w, ((0, 0), (0, Fp - F)))
        b = jnp.pad(b, (0, Fp - F))
    b2 = b.reshape(1, Fp)

    grid = (Bp // tile_b, Fp // tile_n)

    # Explicit VMEM budget: double-buffered x / w / bias / out tiles + headroom.
    isz = jnp.dtype(x.dtype).itemsize
    bsz = jnp.dtype(b2.dtype).itemsize
    osz = jnp.dtype(out_dtype).itemsize
    working_set = 2 * (tile_b * K * isz + K * tile_n * isz
                       + tile_n * bsz + tile_b * tile_n * osz)
    vmem_limit = int(max(working_set + (4 << 20), 32 << 20))  # <= 64 MiB on v7x

    out = pl.pallas_call(
        _decoder_kernel,
        out_shape=jax.ShapeDtypeStruct((Bp, Fp), out_dtype),
        grid_spec=pltpu.PrefetchScalarGridSpec(
            num_scalar_prefetch=0,
            grid=grid,
            in_specs=[
                pl.BlockSpec((tile_b, K), lambda i, j: (i, 0)),   # x row tile
                pl.BlockSpec((K, tile_n), lambda i, j: (0, j)),   # weight col tile
                pl.BlockSpec((1, tile_n), lambda i, j: (0, j)),   # bias col tile
            ],
            out_specs=pl.BlockSpec((tile_b, tile_n), lambda i, j: (i, j)),
        ),
        compiler_params=pltpu.CompilerParams(
            dimension_semantics=("parallel", "parallel"),
            vmem_limit_bytes=vmem_limit,
        ),
    )(x, w, b2)

    return out[:B, :F]


if __name__ == "__main__":
    # Small, deterministic example consistent with the module's forward:
    # Decoder(features=32) applied to a batch of 8 rows of 128-dim codes.
    key = jax.random.PRNGKey(0)
    kx, kw, kb = jax.random.split(key, 3)

    batch, features = 8, 32
    x = jax.random.normal(kx, (batch, IN_DIM), dtype=jnp.float32)

    # PyTorch Linear default init is uniform(-1/sqrt(in_features), 1/sqrt(in_features))
    bound = 1.0 / (IN_DIM ** 0.5)
    w = jax.random.uniform(kw, (IN_DIM, features), jnp.float32, -bound, bound)
    b = jax.random.uniform(kb, (features,), jnp.float32, -bound, bound)

    out = decoder_forward(x, w, b)
    out = jax.block_until_ready(out)

    # Correctness check against a plain-JAX reference of the PyTorch forward.
    ref = jax.nn.sigmoid(jnp.maximum(x @ w + b, 0.0))
    assert out.shape == (batch, features)
    assert jnp.allclose(out, ref, atol=1e-5, rtol=1e-5)

    print("KERNEL_OK")
</pallas_src>

<mosaic_0001>
module attributes {stable_mosaic.version = 11 : i64} {
  func.func @_decoder_kernel(%arg0: i32, %arg1: i32, %arg2: memref<8x128xf32, #tpu.memory_space<vmem>>, %arg3: memref<128x32xf32, #tpu.memory_space<vmem>>, %arg4: memref<1x32xf32, #tpu.memory_space<vmem>>, %arg5: memref<8x32xf32, #tpu.memory_space<vmem>>) attributes {dimension_semantics = [#tpu.dimension_semantics<parallel>, #tpu.dimension_semantics<parallel>], iteration_bounds = array<i64: 1, 1>, scalar_prefetch = 0 : i64, scratch_operands = 0 : i64, tpu.core_type = #tpu.core_type<tc>, window_params = [{transform_indices = @transform_0, window_bounds = array<i64: 8, 128>}, {transform_indices = @transform_1, window_bounds = array<i64: 128, 32>}, {transform_indices = @transform_2, window_bounds = array<i64: 1, 32>}, {transform_indices = @transform_3, window_bounds = array<i64: 8, 32>}]} {
    %c0 = arith.constant 0 : index
    %c0_0 = arith.constant 0 : index
    %0 = vector.load %arg2[%c0, %c0_0] : memref<8x128xf32, #tpu.memory_space<vmem>>, vector<8x128xf32>
    %c0_1 = arith.constant 0 : index
    %c0_2 = arith.constant 0 : index
    %1 = vector.load %arg3[%c0_1, %c0_2] : memref<128x32xf32, #tpu.memory_space<vmem>>, vector<128x32xf32>
    %cst = arith.constant dense<0.000000e+00> : vector<8x32xf32>
    %2 = tpu.matmul %0, %1, %cst {dimension_numbers = #tpu.dot_dimension_numbers<[1], [0], [0], [1], [0, 0, 1, 1], [], []>} : vector<8x128xf32>, vector<128x32xf32>, vector<8x32xf32> -> vector<8x32xf32>
    %c0_3 = arith.constant 0 : index
    %c0_4 = arith.constant 0 : index
    %3 = vector.load %arg4[%c0_3, %c0_4] : memref<1x32xf32, #tpu.memory_space<vmem>>, vector<1x32xf32>
    %4 = vector.broadcast %3 : vector<1x32xf32> to vector<8x32xf32>
    %5 = arith.addf %2, %4 : vector<8x32xf32>
    %cst_5 = arith.constant 0.000000e+00 : f32
    %6 = vector.broadcast %cst_5 : f32 to vector<8x32xf32>
    %7 = arith.maximumf %5, %6 : vector<8x32xf32>
    %8 = arith.negf %7 : vector<8x32xf32>
    %9 = math.exp %8 : vector<8x32xf32>
    %cst_6 = arith.constant 1.000000e+00 : f32
    %10 = vector.broadcast %cst_6 : f32 to vector<8x32xf32>
    %11 = arith.addf %10, %9 : vector<8x32xf32>
    %12 = arith.divf %10, %11 : vector<8x32xf32>
    %c0_7 = arith.constant 0 : index
    %c0_8 = arith.constant 0 : index
    %13 = vector.load %arg5[%c0_7, %c0_8] : memref<8x32xf32, #tpu.memory_space<vmem>>, vector<8x32xf32>
    tpu.vector_store %arg5[%c0_7, %c0_8], %12 {strides = array<i32>} : memref<8x32xf32, #tpu.memory_space<vmem>>, vector<8x32xf32>,
    return
  }
  func.func @transform_0(%arg0: i32, %arg1: i32) -> (i32, i32) {
    %c0_i32 = arith.constant 0 : i32
    %c0_i32_0 = arith.constant 0 : i32
    return %arg0, %c0_i32 : i32, i32
  }
  func.func @transform_1(%arg0: i32, %arg1: i32) -> (i32, i32) {
    %c0_i32 = arith.constant 0 : i32
    %c0_i32_0 = arith.constant 0 : i32
    return %c0_i32, %arg1 : i32, i32
  }
  func.func @transform_2(%arg0: i32, %arg1: i32) -> (i32, i32) {
    %c0_i32 = arith.constant 0 : i32
    %c0_i32_0 = arith.constant 0 : i32
    return %c0_i32, %arg1 : i32, i32
  }
  func.func @transform_3(%arg0: i32, %arg1: i32) -> (i32, i32) {
    %c0_i32 = arith.constant 0 : i32
    return %arg0, %arg1 : i32, i32
  }
}

</mosaic_0001>

<bundles_post_ra>
// kernel: tpu_custom_call.1
= control target key start
LH: loop header
LB: loop body
LE: loop exit
PB: predicated region body
PF: predicated region fallthrough
CT: control target
= control target key end

     0   :  { %v242_v3 = vmov 0.0|0.0   ;;  %vm243_vm0 = vmmov 0   ;;  %v244_v6 = vmov 0.0   ;;  %s332_s0 = inlined_call_operand.vmem [shape: f32[8,128], index: 0, kind: input, shape index: {}]   ;;  %s333_s1 = inlined_call_operand.vmem [shape: f32[128,32], index: 1, kind: input, shape index: {}]   ;;  %s334_s2 = inlined_call_operand.vmem [shape: f32[1,32], index: 2, kind: input, shape index: {}]   ;;  %s335_s3 = inlined_call_operand.hbm [shape: f32[8,32], index: 3, kind: output, shape index: {}]  }
   0x1   :  { %v16_v0 = vld [vmem:[%s333_s1] sm:$0xff]  ;;  %v17_v1 = vld [vmem:[%s333_s1 + $0x8] sm:$0xff]  ;;  %v18_v2 = vld [vmem:[%s333_s1 + $0x10] sm:$0xff]  ;;  %186 = vmatprep.subr.bf16.mxu0 %v242_v3  ;;  %183 = vmatprep.mubr.msk.f32.mxu0 %vm243_vm0, %v244_v6 }
   0x2   :  { %v187_v4 = vpack.c.bf16 %v17_v1, %v16_v0  ;;  %v19_v5 = vld [vmem:[%s333_s1 + $0x18] sm:$0xff]  ;;  %v20_v8 = vld [vmem:[%s333_s1 + $0x20] sm:$0xff]  ;;  %v21_v9 = vld [vmem:[%s333_s1 + $0x28] sm:$0xff] }
   0x3   :  { %v190_v7 = vpack.c.bf16 %v19_v5, %v18_v2 }
   0x4   :  { %188 = vmatpush3.bf16.msra.mxu0 %v187_v4 }
   0x5   :  { %189 = vmatprep.subr.bf16.mxu0 %v242_v3 }
   0x6   :  { %8 = vsyncpa [#allocation3], 0  ;;  %v193_v10 = vpack.c.bf16 %v21_v9, %v20_v8  ;;  %v22_v11 = vld [vmem:[%s333_s1 + $0x30] sm:$0xff]  ;;  %v23_v12 = vld [vmem:[%s333_s1 + $0x38] sm:$0xff]  ;;  %vm116_vm1 = vcmask 261120  }
   0x7   :  { %v196_v13 = vpack.c.bf16 %v23_v12, %v22_v11  ;;  %v24_v14 = vld [vmem:[%s333_s1 + $0x40] sm:$0xff]  ;;  %v25_v15 = vld [vmem:[%s333_s1 + $0x48] sm:$0xff]  ;;  %v26_v17 = vld [vmem:[%s333_s1 + $0x50] sm:$0xff] }
   0x8   :  { %191 = vmatpush3.bf16.msra.mxu0 %v190_v7  ;;  %v199_v16 = vpack.c.bf16 %v25_v15, %v24_v14  ;;  %v27_v18 = vld [vmem:[%s333_s1 + $0x58] sm:$0xff]  ;;  %v28_v20 = vld [vmem:[%s333_s1 + $0x60] sm:$0xff]  ;;  %v29_v21 = vld [vmem:[%s333_s1 + $0x68] sm:$0xff] }
   0x9   :  { %192 = vmatprep.subr.bf16.mxu0 %v242_v3  ;;  %v202_v19 = vpack.c.bf16 %v27_v18, %v26_v17  ;;  %v205_v22 = vpack.c.bf16 %v29_v21, %v28_v20  ;;  %v30_v23 = vld [vmem:[%s333_s1 + $0x70] sm:$0xff]  ;;  %v31_v24 = vld [vmem:[%s333_s1 + $0x78] sm:$0xff]  ;;  %v15_v26 = vld [vmem:[%s332_s0] sm:$0xff]  ;;  %s245_s1 = smov [#allocation2]  }
   0xa   :  { %v208_v25 = vpack.c.bf16 %v31_v24, %v30_v23  ;;  %v132_v27 = vld [vmem:[%s334_s2] ss:$0 sm:$0xff]  ;;  %s124_s21 = sshll.u32 %s245_s1, 4  ;;  %s125_s21 = int_to_ptr.vmem [resolvable:$true] %s124_s21 }
   0xb   :  { %s218_s0 = scalar_lea.vmem %s125_s21, 128  ;;  %p223_p1 = scmp.lt.s32.totalorder %s125_s21, %s125_s21 }
   0xc   :  { %194 = vmatpush3.bf16.msra.mxu0 %v193_v10  ;;  %p219_p0 = scmp.ne.s32.totalorder %s125_s21, %s218_s0  ;;  %p224_p2 = scmp.lt.s32.totalorder %s218_s0, %s218_s0 }
   0xd   :  { %195 = vmatprep.subr.bf16.mxu0 %v242_v3 }
   0xe   :  { %p225_p3 = por %p224_p2, %p223_p1 }
  0x10   :  { %197 = vmatpush3.bf16.msra.mxu0 %v196_v13  ;;  %p226_p4 = pnand %p225_p3, %p219_p0 }
  0x11   :  { %198 = vmatprep.subr.bf16.mxu0 %v242_v3 }
  0x14   :  { %200 = vmatpush3.bf16.msra.mxu0 %v199_v16 }
  0x15   :  { %201 = vmatprep.subr.bf16.mxu0 %v242_v3 }
  0x18   :  { %203 = vmatpush3.bf16.msra.mxu0 %v202_v19 }
  0x19   :  { %204 = vmatprep.subr.bf16.mxu0 %v242_v3 }
  0x1c   :  { %206 = vmatpush3.bf16.msra.mxu0 %v205_v22 }
  0x1d   :  { %207 = vmatprep.subr.bf16.mxu0 %v242_v3 }
  0x20   :  { %209 = vmatpush3.bf16.msra.mxu0 %v208_v25 }
  0x23   :  { %184 = vmatmul.mubr.f32.vlgmr.msra.gmra.mrb[0].mxu0 %v15_v26 }
  0xf6   :  { %v105_v28 = vpop.f32.mrb[0].mxu0 }
  0xf7   :  { %v106_v29 = vadd.f32 %v132_v27, %v105_v28  ;;  %v185_v30 = vpop.f32.mrb[1].mxu0 }
  0xf9   :  { %v109_v31 = vmax.f32 %v106_v29, 0.0 }
  0xfb   :  { %v133_v32 = vmul.f32 -1.442695, %v109_v31 }
  0xfd   :  { %214 = vpow2.f32 %v133_v32 }
 0x107   :  { %v215_v33 = vpop.eup %214 }
 0x108   :  { %v113_v34 = vadd.f32 1.0, %v215_v33 }
 0x10a   :  { %216 = vrcp.f32 %v113_v34 }
 0x114   :  { %v217_v35 = vpop.eup %216 }
 0x115   :  { %117 = vst.msk [vmem:[#allocation2] sm:$0xff] %vm116_vm1, %v217_v35 }
 0x116   :  { %229 = shalt.err (!%p226_p4)
}
 0x117   :  { %s230_s23 = scalar_lea.hbm %s335_s3, 128 }
 0x118   :  { %p231_p5 = scmp.ne.s32.totalorder %s335_s3, %s230_s23  ;;  %p234_p6 = scmp.lt.u32.totalorder %s230_s23, %s335_s3 }
 0x11a   :  { %p236_p7 = pnand %p234_p6, %p231_p5 }
 0x11c   :  { %239 = shalt.err (!%p236_p7)
}
 0x11d   :  { %127 = dma.vmem_to_hbm [thread:$0]  %s125_s21, 128, %s335_s3, [#allocation3]  }
 0x11e   :  { %240 = dma.done.wait [#allocation3], 128  }
 0x11f   :  { %241 = vsyncadd [#allocation3], 4294967168 }
 0x120   :  { %131 = vsyncpa [#allocation3], 1 }

</bundles_post_ra>
